<compile_context>
chip_gen: v6e
topology: v6e:2x2x1
jax: 0.10.0
libtpu: 0.0.40
codegen_flags: <defaults>
</compile_context>

<pallas_src>
import functools
import math

import jax
import jax.numpy as jnp
from jax import lax
from jax.experimental import pallas as pl
from jax.experimental.pallas import tpu as pltpu


# ----------------------------------------------------------------------------
# Helpers
# ----------------------------------------------------------------------------
def _sublane_align(dtype):
    """Minimum second-minor tile multiple for a dtype (8 f32, 16 bf16, 32 i8)."""
    return {4: 8, 2: 16, 1: 32}.get(jnp.dtype(dtype).itemsize, 8)


def _pick_tile(dim, target, align):
    """Largest multiple of `align` <= target that divides dim, else full dim."""
    if dim <= target:
        return dim
    t = (target // align) * align
    while t >= align:
        if dim % t == 0:
            return t
        t -= align
    return dim  # full dimension is always a legal block


@functools.lru_cache(maxsize=None)
def _vmem_budget_bytes():
    """~75% of physical VMEM: ~96 MiB on 128-MiB parts (v5e/v6e), 48 MiB on
    64-MiB parts (v7x). Falls back to 48 MiB if the query is unavailable."""
    cap = 64 * 1024 * 1024
    try:
        info = pltpu.get_tpu_info()
        cap = int(getattr(info, "vmem_capacity_bytes", cap) or cap)
    except Exception:
        pass
    return int(min(cap * 3 // 4, 100 * 1024 * 1024))


# ----------------------------------------------------------------------------
# Tiled GEMM:  y = x @ w   (w is already [in, out])
# ----------------------------------------------------------------------------
def _matmul_kernel(x_ref, w_ref, o_ref, acc_ref):
    @pl.when(pl.program_id(2) == 0)
    def _init():
        acc_ref[...] = jnp.zeros_like(acc_ref)

    acc_ref[...] += jnp.dot(
        x_ref[...], w_ref[...], preferred_element_type=jnp.float32
    )

    @pl.when(pl.program_id(2) == pl.num_programs(2) - 1)
    def _finalize():
        o_ref[...] = acc_ref[...].astype(o_ref.dtype)


def linear(x, w, *, tm=512, tn=512, tk=512, out_dtype=None):
    """x: [M, K], w: [K, N] -> [M, N]. f32 accumulation in VMEM scratch."""
    M, K = x.shape
    K2, N = w.shape
    assert K == K2
    out_dtype = out_dtype or x.dtype
    tm = _pick_tile(M, tm, _sublane_align(x.dtype))  # second-minor of x / out
    tn = _pick_tile(N, tn, 128)                      # lane dim of w / out
    tk = _pick_tile(K, tk, 128)                      # lane of x, 2nd-minor of w
    grid = (M // tm, N // tn, K // tk)
    return pl.pallas_call(
        _matmul_kernel,
        out_shape=jax.ShapeDtypeStruct((M, N), out_dtype),
        grid_spec=pltpu.PrefetchScalarGridSpec(
            num_scalar_prefetch=0,
            grid=grid,
            in_specs=[
                pl.BlockSpec((tm, tk), lambda i, j, k: (i, k)),
                pl.BlockSpec((tk, tn), lambda i, j, k: (k, j)),
            ],
            out_specs=pl.BlockSpec((tm, tn), lambda i, j, k: (i, j)),
            scratch_shapes=[pltpu.VMEM((tm, tn), jnp.float32)],
        ),
        compiler_params=pltpu.CompilerParams(
            dimension_semantics=("parallel", "parallel", "arbitrary"),
            vmem_limit_bytes=_vmem_budget_bytes(),
        ),
    )(x, w)


# ----------------------------------------------------------------------------
# Flash-style SDPA reading directly from the fused QKV GEMM output [B*S, 3H]
# and writing a lane-dense [B*S, H] result (heads merged inside the kernel).
# ----------------------------------------------------------------------------
def _flash_kernel(q_ref, k_ref, v_ref, o_ref, m_sc, l_sc, acc_sc,
                  *, num_heads, head_dim):
    ki = pl.program_id(2)

    @pl.when(ki == 0)
    def _init():
        m_sc[...] = jnp.full_like(m_sc, -jnp.inf)
        l_sc[...] = jnp.zeros_like(l_sc)
        acc_sc[...] = jnp.zeros_like(acc_sc)

    # Per-head online softmax.  Q is pre-scaled (1/sqrt(D) folded into the QKV
    # weight in prepare_params) so there is no per-step rescale here.  The
    # score matmul contracts the last axes (MXU trans_b form) -> no transposed
    # copy of K is materialized in VMEM.
    # TODO(synk): attention_mask (additive bias) not plumbed in; the module is
    # exercised with attention_mask=None.
    for h in range(num_heads):
        d0 = h * head_dim
        qh = q_ref[:, d0:d0 + head_dim]                      # (tq, D)
        kh = k_ref[:, d0:d0 + head_dim]                      # (tk, D)
        vh = v_ref[:, d0:d0 + head_dim]                      # (tk, D)
        s = lax.dot_general(qh, kh, (((1,), (1,)), ((), ())),
                            preferred_element_type=jnp.float32)   # (tq, tk)
        m_prev = m_sc[h]                                     # (tq, 1)
        m_new = jnp.maximum(m_prev, jnp.max(s, axis=-1, keepdims=True))
        alpha = jnp.exp(m_prev - m_new)
        p = jnp.exp(s - m_new)
        l_sc[h] = alpha * l_sc[h] + jnp.sum(p, axis=-1, keepdims=True)
        acc_sc[h] = alpha * acc_sc[h] + lax.dot_general(
            p.astype(vh.dtype), vh, (((1,), (0,)), ((), ())),
            preferred_element_type=jnp.float32)
        m_sc[h] = m_new

    @pl.when(ki == pl.num_programs(2) - 1)
    def _finalize():
        # Heads are merged back into the hidden dim here, so the output block
        # is a lane-dense (tq, H) tile of [B*S, H]: no XLA transpose/reshape
        # (and no extra HBM round trip) is needed before the out-projection.
        # Exact reciprocal (runs once per q-tile -> tight numerics for free).
        for h in range(num_heads):
            d0 = h * head_dim
            inv_l = pl.reciprocal(l_sc[h], approx=False)
            o_ref[:, d0:d0 + head_dim] = (acc_sc[h] * inv_l).astype(o_ref.dtype)


def flash_attention(qkv, batch, seq, num_heads, head_dim,
                    *, tq=256, tk=256, out_dtype=None):
    """qkv: [B*S, 3H] (Q | K | V column blocks) -> attention output [B*S, H].

    Grid = (B, q-tiles, kv-tiles); the KV axis is last/"arbitrary" (reduction),
    B and q-tiles are "parallel" (v7x megacore sharding).  Per-step VMEM is
    bounded by tq/tk * H regardless of head count, so it fits v7x's 64 MiB.
    """
    hidden = num_heads * head_dim
    M, three_h = qkv.shape
    assert M == batch * seq and three_h == 3 * hidden
    tq = _pick_tile(seq, tq, _sublane_align(qkv.dtype))
    tk = _pick_tile(seq, tk, 128)   # contraction depth of PV / score tile width
    nq, nk = seq // tq, seq // tk
    out_dtype = out_dtype or qkv.dtype

    # Three views of the same fused-QKV array: column block 0 = Q, 1 = K, 2 = V.
    q_spec = pl.BlockSpec((tq, hidden), lambda b, qi, ki: (b * nq + qi, 0))
    k_spec = pl.BlockSpec((tk, hidden), lambda b, qi, ki: (b * nk + ki, 1))
    v_spec = pl.BlockSpec((tk, hidden), lambda b, qi, ki: (b * nk + ki, 2))
    o_spec = pl.BlockSpec((tq, hidden), lambda b, qi, ki: (b * nq + qi, 0))
    # TODO(synk): optionally sweep pipeline_mode=pl.Buffered(3) on k/v specs and
    # fuse the out-projection as an epilogue GEMM in the finalize.

    kernel = functools.partial(_flash_kernel, num_heads=num_heads,
                               head_dim=head_dim)
    return pl.pallas_call(
        kernel,
        out_shape=jax.ShapeDtypeStruct((M, hidden), out_dtype),
        grid_spec=pltpu.PrefetchScalarGridSpec(
            num_scalar_prefetch=0,
            grid=(batch, nq, nk),
            in_specs=[q_spec, k_spec, v_spec],
            out_specs=o_spec,
            scratch_shapes=[
                pltpu.VMEM((num_heads, tq, 1), jnp.float32),        # running max
                pltpu.VMEM((num_heads, tq, 1), jnp.float32),        # running sum
                pltpu.VMEM((num_heads, tq, head_dim), jnp.float32),  # accumulator
            ],
        ),
        compiler_params=pltpu.CompilerParams(
            dimension_semantics=("parallel", "parallel", "arbitrary"),
            vmem_limit_bytes=_vmem_budget_bytes(),
        ),
    )(qkv, qkv, qkv)


# ----------------------------------------------------------------------------
# Module forward (glue in plain JAX, hot paths in Pallas)
# ----------------------------------------------------------------------------
def prepare_params(torch_params, head_dim):
    """One-time weight prep (outside the hot path): transpose PyTorch's
    [out, in] weights to [in, out], fuse Q/K/V into one [H, 3H] operand and
    fold the 1/sqrt(head_dim) attention scale into the Q columns."""
    scale = 1.0 / math.sqrt(head_dim)
    w_qkv = jnp.concatenate(
        [torch_params["wq"].T * scale, torch_params["wk"].T, torch_params["wv"].T],
        axis=1,
    )
    return {"w_qkv": w_qkv, "w_out": torch_params["wo"].T}


def attention_forward(hidden_states, prepared, num_heads, head_dim,
                      *, compute_dtype=None):
    """Replicates Attention.forward(hidden_states) for attention_mask=None,
    eval mode (dropout identity), use_cache=False. Returns [B, S, H]."""
    B, S, H = hidden_states.shape
    assert H == num_heads * head_dim
    w_qkv, w_out = prepared["w_qkv"], prepared["w_out"]

    x2d = hidden_states.reshape(B * S, H)
    if compute_dtype is not None:
        # Feed the MXU narrow operands (e.g. bf16 on v6e/v7x); accumulation
        # inside the kernels stays f32 via preferred_element_type.
        x2d = x2d.astype(compute_dtype)
        w_qkv = w_qkv.astype(compute_dtype)
        w_out = w_out.astype(compute_dtype)

    qkv = linear(x2d, w_qkv)                                 # fused QKV GEMM
    attn = flash_attention(qkv, B, S, num_heads, head_dim)   # [B*S, H], lane-dense
    out = linear(attn, w_out)                                # out projection
    # TODO(synk): nn.Dropout is identity in eval mode; PagedKVCache / use_cache
    # incremental-decode paths are not implemented.
    return out.reshape(B, S, H).astype(hidden_states.dtype)


# ----------------------------------------------------------------------------
# Pure-JAX reference for sanity check
# ----------------------------------------------------------------------------
def attention_forward_ref(hidden_states, params, num_heads, head_dim):
    B, S, H = hidden_states.shape
    q = hidden_states @ params["wq"].T
    k = hidden_states @ params["wk"].T
    v = hidden_states @ params["wv"].T

    def sh(t):
        return t.reshape(B, S, num_heads, head_dim).transpose(0, 2, 1, 3)

    qh, kh, vh = sh(q), sh(k), sh(v)
    scores = jnp.einsum("bhqd,bhkd->bhqk", qh, kh) / math.sqrt(head_dim)
    probs = jax.nn.softmax(scores, axis=-1)
    attn = jnp.einsum("bhqk,bhkd->bhqd", probs, vh)
    attn = attn.transpose(0, 2, 1, 3).reshape(B, S, H)
    return attn @ params["wo"].T


# ----------------------------------------------------------------------------
# Main
# ----------------------------------------------------------------------------
if __name__ == "__main__":
    # Small config consistent with AttentionConfig (hidden = num_heads * head_dim)
    num_heads, head_dim = 4, 32
    hidden = num_heads * head_dim        # 128 (lane-width friendly)
    batch, seq = 2, 16

    key = jax.random.PRNGKey(0)
    k_x, k_q, k_k, k_v, k_o = jax.random.split(key, 5)

    x = jax.random.normal(k_x, (batch, seq, hidden), dtype=jnp.float32)
    params = {  # PyTorch nn.Linear weight layout: [out_features, in_features]
        "wq": 0.02 * jax.random.normal(k_q, (hidden, hidden), dtype=jnp.float32),
        "wk": 0.02 * jax.random.normal(k_k, (hidden, hidden), dtype=jnp.float32),
        "wv": 0.02 * jax.random.normal(k_v, (hidden, hidden), dtype=jnp.float32),
        "wo": 0.02 * jax.random.normal(k_o, (hidden, hidden), dtype=jnp.float32),
    }
    prepared = prepare_params(params, head_dim)  # transposed / QKV-fused / Q-scaled once

    # f32 path: tight numerics check.
    out = jax.block_until_ready(attention_forward(x, prepared, num_heads, head_dim))
    ref = attention_forward_ref(x, params, num_heads, head_dim)
    assert out.shape == (batch, seq, hidden), out.shape
    assert jnp.allclose(out, ref, atol=2e-3, rtol=2e-3), float(jnp.abs(out - ref).max())

    # bf16 MXU path (v6e/v7x recommendation): f32 accumulation, looser check.
    out_bf16 = jax.block_until_ready(
        attention_forward(x, prepared, num_heads, head_dim, compute_dtype=jnp.bfloat16)
    )
    assert jnp.allclose(out_bf16, ref, atol=5e-2, rtol=5e-2), \
        float(jnp.abs(out_bf16 - ref).max())

    print("KERNEL_OK")
</pallas_src>

<mosaic_0001>
module attributes {stable_mosaic.version = 11 : i64} {
  func.func @_matmul_kernel(%arg0: i32, %arg1: i32, %arg2: i32, %arg3: memref<32x128xf32, #tpu.memory_space<vmem>>, %arg4: memref<128x384xf32, #tpu.memory_space<vmem>>, %arg5: memref<32x384xf32, #tpu.memory_space<vmem>>, %arg6: memref<32x384xf32, #tpu.memory_space<vmem>>) attributes {dimension_semantics = [#tpu.dimension_semantics<parallel>, #tpu.dimension_semantics<parallel>, #tpu.dimension_semantics<arbitrary>], iteration_bounds = array<i64: 1, 1, 1>, scalar_prefetch = 0 : i64, scratch_operands = 1 : i64, tpu.core_type = #tpu.core_type<tc>, window_params = [{transform_indices = @transform_0, window_bounds = array<i64: 32, 128>}, {transform_indices = @transform_1, window_bounds = array<i64: 128, 384>}, {transform_indices = @transform_2, window_bounds = array<i64: 32, 384>}]} {
    %c0_i32 = arith.constant 0 : i32
    %0 = arith.cmpi eq, %arg2, %c0_i32 : i32
    %1 = arith.extui %0 : i1 to i32
    %c0_i32_0 = arith.constant 0 : i32
    %2 = arith.cmpi ne, %1, %c0_i32_0 : i32
    scf.if %2 {
      %cst_10 = arith.constant 0.000000e+00 : f32
      %12 = vector.broadcast %cst_10 : f32 to vector<32x384xf32>
      %c0_11 = arith.constant 0 : index
      %c0_12 = arith.constant 0 : index
      %13 = vector.load %arg6[%c0_11, %c0_12] : memref<32x384xf32, #tpu.memory_space<vmem>>, vector<32x384xf32>
      tpu.vector_store %arg6[%c0_11, %c0_12], %12 {strides = array<i32>} : memref<32x384xf32, #tpu.memory_space<vmem>>, vector<32x384xf32>,
    } else {
    }
    %c0 = arith.constant 0 : index
    %c0_1 = arith.constant 0 : index
    %3 = vector.load %arg6[%c0, %c0_1] : memref<32x384xf32, #tpu.memory_space<vmem>>, vector<32x384xf32>
    %c0_2 = arith.constant 0 : index
    %c0_3 = arith.constant 0 : index
    %4 = vector.load %arg3[%c0_2, %c0_3] : memref<32x128xf32, #tpu.memory_space<vmem>>, vector<32x128xf32>
    %c0_4 = arith.constant 0 : index
    %c0_5 = arith.constant 0 : index
    %5 = vector.load %arg4[%c0_4, %c0_5] : memref<128x384xf32, #tpu.memory_space<vmem>>, vector<128x384xf32>
    %cst = arith.constant dense<0.000000e+00> : vector<32x384xf32>
    %6 = tpu.matmul %4, %5, %cst {dimension_numbers = #tpu.dot_dimension_numbers<[1], [0], [0], [1], [0, 0, 1, 1], [], []>} : vector<32x128xf32>, vector<128x384xf32>, vector<32x384xf32> -> vector<32x384xf32>
    %7 = arith.addf %3, %6 : vector<32x384xf32>
    %c0_6 = arith.constant 0 : index
    %c0_7 = arith.constant 0 : index
    %8 = vector.load %arg6[%c0_6, %c0_7] : memref<32x384xf32, #tpu.memory_space<vmem>>, vector<32x384xf32>
    tpu.vector_store %arg6[%c0_6, %c0_7], %7 {strides = array<i32>} : memref<32x384xf32, #tpu.memory_space<vmem>>, vector<32x384xf32>,
    %c0_i32_8 = arith.constant 0 : i32
    %9 = arith.cmpi eq, %arg2, %c0_i32_8 : i32
    %10 = arith.extui %9 : i1 to i32
    %c0_i32_9 = arith.constant 0 : i32
    %11 = arith.cmpi ne, %10, %c0_i32_9 : i32
    scf.if %11 {
      %c0_10 = arith.constant 0 : index
      %c0_11 = arith.constant 0 : index
      %12 = vector.load %arg6[%c0_10, %c0_11] : memref<32x384xf32, #tpu.memory_space<vmem>>, vector<32x384xf32>
      %c0_12 = arith.constant 0 : index
      %c0_13 = arith.constant 0 : index
      %13 = vector.load %arg5[%c0_12, %c0_13] : memref<32x384xf32, #tpu.memory_space<vmem>>, vector<32x384xf32>
      tpu.vector_store %arg5[%c0_12, %c0_13], %12 {strides = array<i32>} : memref<32x384xf32, #tpu.memory_space<vmem>>, vector<32x384xf32>,
    } else {
    }
    return
  }
  func.func @transform_0(%arg0: i32, %arg1: i32, %arg2: i32) -> (i32, i32) {
    %c0_i32 = arith.constant 0 : i32
    return %arg0, %arg2 : i32, i32
  }
  func.func @transform_1(%arg0: i32, %arg1: i32, %arg2: i32) -> (i32, i32) {
    %c0_i32 = arith.constant 0 : i32
    return %arg2, %arg1 : i32, i32
  }
  func.func @transform_2(%arg0: i32, %arg1: i32, %arg2: i32) -> (i32, i32) {
    %c0_i32 = arith.constant 0 : i32
    return %arg0, %arg1 : i32, i32
  }
}

</mosaic_0001>

<bundles_post_ra>
// kernel: tpu_custom_call.1
= control target key start
LH: loop header
LB: loop body
LE: loop exit
PB: predicated region body
PF: predicated region fallthrough
CT: control target
= control target key end

     0   :  { %7 = vsyncpa [#allocation4], 0  ;;  %s537_s0 = inlined_call_operand.hbm [shape: f32[32,128], index: 0, kind: input, shape index: {}]   ;;  %s538_s1 = inlined_call_operand.hbm [shape: f32[128,384], index: 1, kind: input, shape index: {}]   ;;  %s539_s2 = inlined_call_operand.hbm [shape: f32[32,384], index: 2, kind: output, shape index: {}]  }
   0x1   :  { %8 = vsyncpa [#allocation7], 0 }
   0x2   :  { %9 = vsyncpa [#allocation5], 0  ;;  %s495_s9 = smov [#allocation3]  }
   0x3   :  { %s15_s10 = sshll.u32 %s495_s9, 4  ;;  %s16_s10 = int_to_ptr.vmem [resolvable:$true] %s15_s10 }
   0x4   :  { %s437_s11 = scalar_lea.vmem %s16_s10, 512  ;;  %p442_p1 = scmp.lt.s32.totalorder %s16_s10, %s16_s10 }
   0x5   :  { %p438_p0 = scmp.ne.s32.totalorder %s16_s10, %s437_s11  ;;  %p443_p2 = scmp.lt.s32.totalorder %s437_s11, %s437_s11 }
   0x7   :  { %p444_p3 = por %p443_p2, %p442_p1 }
   0x9   :  { %p445_p4 = pnand %p444_p3, %p438_p0 }
   0xb   :  { %448 = shalt.err (!%p445_p4)
}
   0xc   :  { %s496_s12 = smov 128   ;;  %s497_s13 = smov 8  }
   0xd   :  { %21 = dma.hbm_to_vmem [thread:$0]  %s537_s0, 512, %s16_s10, [#allocation4], %s496_s12, %s496_s12, %s497_s13  }
   0xe   :  { %s498_s16 = smov [#allocation6]  }
   0xf   :  { %s27_s17 = sshll.u32 %s498_s16, 4  ;;  %s28_s17 = int_to_ptr.vmem [resolvable:$true] %s27_s17 }
  0x10   :  { %s457_s18 = scalar_lea.vmem %s28_s17, 6144  ;;  %p462_p6 = scmp.lt.s32.totalorder %s28_s17, %s28_s17 }
  0x11   :  { %p458_p5 = scmp.ne.s32.totalorder %s28_s17, %s457_s18  ;;  %p463_p7 = scmp.lt.s32.totalorder %s457_s18, %s457_s18 }
  0x13   :  { %p464_p8 = por %p463_p7, %p462_p6 }
  0x15   :  { %p465_p9 = pnand %p464_p8, %p458_p5 }
  0x17   :  { %468 = shalt.err (!%p465_p9)
}
  0x18   :  { %s499_s19 = smov 384   ;;  %s500_s20 = smov 24  }
  0x19   :  { %33 = dma.hbm_to_vmem [thread:$0]  %s538_s1, 6144, %s28_s17, [#allocation7], %s499_s19, %s499_s19, %s500_s20  }
  0x1a   :  { %489 = dma.done.wait [#allocation4], 512  }
  0x1b   :  { %490 = vsyncadd [#allocation4], 4294966784 }
  0x1c   :  { %491 = dma.done.wait [#allocation7], 6144  }
  0x1d   :  { %492 = vsyncadd [#allocation7], 4294961152  ;;  %v501_v0 = vmov 0.0   ;;  %v118_v1 = vld [vmem:[#allocation6 + $0x170] sm:$0xff]  ;;  %v117_v2 = vld [vmem:[#allocation6 + $0x168] sm:$0xff]  ;;  %s502_s0 = smov [#allocation8]  }
  0x1e   :  { %184 = vmatprep.mubr.f32.mxu0 %v501_v0  ;;  %v115_v3 = vld [vmem:[#allocation6 + $0x158] sm:$0xff]  ;;  %120 = vmatprep.subr.mxu0 %v118_v1  ;;  %v114_v4 = vld [vmem:[#allocation6 + $0x150] sm:$0xff]  ;;  %v112_v5 = vld [vmem:[#allocation6 + $0x140] sm:$0xff]  ;;  %s350_s1 = sshll.u32 %s502_s0, 4  ;;  %s351_s1 = int_to_ptr.vmem [resolvable:$true] %s350_s1 }
  0x1f   :  { %121 = vmatpush1.msra.mxu0 %v117_v2  ;;  %v119_v6 = vld [vmem:[#allocation6 + $0x178] sm:$0xff]  ;;  %v116_v8 = vld [vmem:[#allocation6 + $0x160] sm:$0xff]  ;;  %v109_v9 = vld [vmem:[#allocation6 + $0x128] sm:$0xff]  ;;  %s469_s23 = scalar_lea.vmem %s351_s1, 1536  ;;  %p474_p11 = scmp.lt.s32.totalorder %s351_s1, %s351_s1 }
  0x20   :  { %122 = vmatprep.subr.mxu0 %v115_v3  ;;  %v111_v7 = vld [vmem:[#allocation6 + $0x138] sm:$0xff]  ;;  %383 = vmatprep.subr.mxu1 %v119_v6  ;;  %v113_v10 = vld [vmem:[#allocation6 + $0x148] sm:$0xff]  ;;  %v108_v11 = vld [vmem:[#allocation6 + $0x120] sm:$0xff]  ;;  %p470_p10 = scmp.ne.s32.totalorder %s351_s1, %s469_s23  ;;  %p475_p12 = scmp.lt.s32.totalorder %s469_s23, %s469_s23 }
  0x21   :  { %123 = vmatpush1.msra.mxu0 %v114_v4  ;;  %384 = vmatpush3.msra.mxu1 %v119_v6  ;;  %v106_v12 = vld [vmem:[#allocation6 + $0x110] sm:$0xff]  ;;  %v105_v14 = vld [vmem:[#allocation6 + $0x108] sm:$0xff]  ;;  %v103_v15 = vld [vmem:[#allocation6 + $0xf8] sm:$0xff] }
  0x22   :  { %124 = vmatprep.subr.mxu0 %v112_v5  ;;  %385 = vmatprep.subr.mxu1 %v116_v8  ;;  %v110_v13 = vld [vmem:[#allocation6 + $0x130] sm:$0xff]  ;;  %v107_v16 = vld [vmem:[#allocation6 + $0x118] sm:$0xff]  ;;  %v100_v18 = vld [vmem:[#allocation6 + $0xe0] sm:$0xff]  ;;  %p476_p13 = por %p475_p12, %p474_p11 }
  0x23   :  { %125 = vmatpush1.msra.mxu0 %v111_v7  ;;  %386 = vmatpush3.msra.mxu1 %v116_v8  ;;  %v102_v17 = vld [vmem:[#allocation6 + $0xf0] sm:$0xff]  ;;  %v104_v19 = vld [vmem:[#allocation6 + $0x100] sm:$0xff]  ;;  %v99_v20 = vld [vmem:[#allocation6 + $0xd8] sm:$0xff] }
  0x24   :  { %126 = vmatprep.subr.mxu0 %v109_v9  ;;  %387 = vmatprep.subr.mxu1 %v113_v10  ;;  %v97_v21 = vld [vmem:[#allocation6 + $0xc8] sm:$0xff]  ;;  %v96_v23 = vld [vmem:[#allocation6 + $0xc0] sm:$0xff]  ;;  %v94_v24 = vld [vmem:[#allocation6 + $0xb0] sm:$0xff]  ;;  %p477_p0 = pnand %p476_p13, %p470_p10 }
  0x25   :  { %127 = vmatpush1.msra.mxu0 %v108_v11  ;;  %388 = vmatpush3.msra.mxu1 %v113_v10  ;;  %v101_v22 = vld [vmem:[#allocation6 + $0xe8] sm:$0xff]  ;;  %v98_v25 = vld [vmem:[#allocation6 + $0xd0] sm:$0xff]  ;;  %v91_v27 = vld [vmem:[#allocation6 + $0x98] sm:$0xff] }
  0x26   :  { %128 = vmatprep.subr.mxu0 %v106_v12  ;;  %389 = vmatprep.subr.mxu1 %v110_v13  ;;  %v93_v26 = vld [vmem:[#allocation6 + $0xa8] sm:$0xff]  ;;  %v95_v28 = vld [vmem:[#allocation6 + $0xb8] sm:$0xff]  ;;  %v90_v29 = vld [vmem:[#allocation6 + $0x90] sm:$0xff] }
  0x27   :  { %129 = vmatpush1.msra.mxu0 %v105_v14  ;;  %390 = vmatpush3.msra.mxu1 %v110_v13  ;;  %v88_v30 = vld [vmem:[#allocation6 + $0x80] sm:$0xff]  ;;  %v87_v32 = vld [vmem:[#allocation6 + $0x78] sm:$0xff]  ;;  %v85_v33 = vld [vmem:[#allocation6 + $0x68] sm:$0xff] }
  0x28   :  { %130 = vmatprep.subr.mxu0 %v103_v15  ;;  %391 = vmatprep.subr.mxu1 %v107_v16  ;;  %v92_v31 = vld [vmem:[#allocation6 + $0xa0] sm:$0xff]  ;;  %v89_v34 = vld [vmem:[#allocation6 + $0x88] sm:$0xff]  ;;  %v82_v36 = vld [vmem:[#allocation6 + $0x50] sm:$0xff] }
  0x29   :  { %131 = vmatpush1.msra.mxu0 %v102_v17  ;;  %392 = vmatpush3.msra.mxu1 %v107_v16  ;;  %v84_v35 = vld [vmem:[#allocation6 + $0x60] sm:$0xff]  ;;  %v86_v37 = vld [vmem:[#allocation6 + $0x70] sm:$0xff]  ;;  %v81_v38 = vld [vmem:[#allocation6 + $0x48] sm:$0xff] }
  0x2a   :  { %132 = vmatprep.subr.mxu0 %v100_v18  ;;  %393 = vmatprep.subr.mxu1 %v104_v19  ;;  %v79_v39 = vld [vmem:[#allocation6 + $0x38] sm:$0xff]  ;;  %v78_v41 = vld [vmem:[#allocation6 + $0x30] sm:$0xff]  ;;  %v76_v42 = vld [vmem:[#allocation6 + $0x20] sm:$0xff] }
  0x2b   :  { %133 = vmatpush1.msra.mxu0 %v99_v20  ;;  %394 = vmatpush3.msra.mxu1 %v104_v19  ;;  %v83_v40 = vld [vmem:[#allocation6 + $0x58] sm:$0xff]  ;;  %v80_v43 = vld [vmem:[#allocation6 + $0x40] sm:$0xff]  ;;  %v73_v45 = vld [vmem:[#allocation6 + $0x8] sm:$0xff] }
  0x2c   :  { %134 = vmatprep.subr.mxu0 %v97_v21  ;;  %395 = vmatprep.subr.mxu1 %v101_v22  ;;  %v75_v44 = vld [vmem:[#allocation6 + $0x18] sm:$0xff]  ;;  %v77_v46 = vld [vmem:[#allocation6 + $0x28] sm:$0xff]  ;;  %v72_v47 = vld [vmem:[#allocation6] sm:$0xff] }
  0x2d   :  { %135 = vmatpush1.msra.mxu0 %v96_v23  ;;  %396 = vmatpush3.msra.mxu1 %v101_v22  ;;  %v68_v48 = vld [vmem:[#allocation3] sm:$0xff]  ;;  %v74_v49 = vld [vmem:[#allocation6 + $0x10] sm:$0xff]  ;;  %v69_v50 = vld [vmem:[#allocation3 + $0x8] sm:$0xff] }
  0x2e   :  { %136 = vmatprep.subr.mxu0 %v94_v24  ;;  %397 = vmatprep.subr.mxu1 %v98_v25  ;;  %v70_v51 = vld [vmem:[#allocation3 + $0x10] sm:$0xff]  ;;  %v71_v52 = vld [vmem:[#allocation3 + $0x18] sm:$0xff] }
  0x2f   :  { %137 = vmatpush1.msra.mxu0 %v93_v26  ;;  %398 = vmatpush3.msra.mxu1 %v98_v25 }
  0x30   :  { %138 = vmatprep.subr.mxu0 %v91_v27  ;;  %399 = vmatprep.subr.mxu1 %v95_v28 }
  0x31   :  { %139 = vmatpush1.msra.mxu0 %v90_v29  ;;  %400 = vmatpush3.msra.mxu1 %v95_v28 }
  0x32   :  { %140 = vmatprep.subr.mxu0 %v88_v30  ;;  %401 = vmatprep.subr.mxu1 %v92_v31 }
  0x33   :  { %141 = vmatpush1.msra.mxu0 %v87_v32  ;;  %402 = vmatpush3.msra.mxu1 %v92_v31 }
  0x34   :  { %142 = vmatprep.subr.mxu0 %v85_v33  ;;  %403 = vmatprep.subr.mxu1 %v89_v34 }
  0x35   :  { %143 = vmatpush1.msra.mxu0 %v84_v35  ;;  %404 = vmatpush3.msra.mxu1 %v89_v34 }
  0x36   :  { %144 = vmatprep.subr.mxu0 %v82_v36  ;;  %405 = vmatprep.subr.mxu1 %v86_v37 }
  0x37   :  { %145 = vmatpush1.msra.mxu0 %v81_v38  ;;  %406 = vmatpush3.msra.mxu1 %v86_v37 }
  0x38   :  { %146 = vmatprep.subr.mxu0 %v79_v39  ;;  %407 = vmatprep.subr.mxu1 %v83_v40 }
  0x39   :  { %147 = vmatpush1.msra.mxu0 %v78_v41  ;;  %408 = vmatpush3.msra.mxu1 %v83_v40 }
  0x3a   :  { %148 = vmatprep.subr.mxu0 %v76_v42  ;;  %409 = vmatprep.subr.mxu1 %v80_v43 }
  0x3b   :  { %149 = vmatpush1.msra.mxu0 %v75_v44  ;;  %410 = vmatpush3.msra.mxu1 %v80_v43 }
  0x3c   :  { %150 = vmatprep.subr.mxu0 %v73_v45  ;;  %411 = vmatprep.subr.mxu1 %v77_v46 }
  0x3d   :  { %151 = vmatpush1.msra.mxu0 %v72_v47  ;;  %412 = vmatpush3.msra.mxu1 %v77_v46 }
  0x3e   :  { %185 = vmatmul.mubr.f32.vlgmr.msra.gmra.mxu0 %v68_v48  ;;  %413 = vmatprep.subr.mxu1 %v74_v49 }
  0x3f   :  { %190 = vmatprep.mubr.f32.mxu0 %v501_v0  ;;  %414 = vmatpush3.msra.mxu1 %v74_v49 }
  0x40   :  { %415 = vmatprep.mubr.f32.mxu1 %v68_v48 }
  0x41   :  { %416 = vmatmul.mubr.f32.vlgmr.msra.gmra.mxu1 %v69_v50 }
  0x42   :  { %191 = vmatmul.mubr.f32.gmra.mxu0 %v69_v50  ;;  %418 = vmatprep.mubr.f32.mxu1 %v70_v51 }
  0x43   :  { %196 = vmatprep.mubr.f32.mxu0 %v501_v0 }
  0x45   :  { %419 = vmatmul.mubr.f32.gmra.mxu1 %v71_v52 }
  0x46   :  { %197 = vmatmul.mubr.f32.gmra.mxu0 %v70_v51 }
  0x47   :  { %202 = vmatprep.mubr.f32.mxu0 %v501_v0 }
  0x4a   :  { %203 = vmatmul.mubr.f32.gmra.mxu0 %v71_v52 }
  0xfe   :  { %v186_v53 = vpop.f32.mrf.mxu0 }
  0xff   :  { %333 = vst [vmem:[#allocation8] sm:$0xff] %v186_v53 }
 0x100   :  { %v188_v54 = vpop.f32.mrf.mxu0 }
 0x101   :  { %334 = vst [vmem:[#allocation8 + $0x8] sm:$0xff] %v188_v54  ;;  %v417_v55 = vpop.f32.mrf.mxu1 }
 0x102   :  { %v192_v56 = vpop.f32.mrf.mxu0  ;;  %338 = vst [vmem:[#allocation8 + $0x28] sm:$0xff] %v417_v55 }
 0x103   :  { %336 = vst [vmem:[#allocation8 + $0x18] sm:$0xff] %v192_v56  ;;  %v275_v57 = vpop.f32.mrf.mxu1 }
 0x104   :  { %v194_v58 = vpop.f32.mrf.mxu0  ;;  %335 = vst [vmem:[#allocation8 + $0x10] sm:$0xff] %v275_v57 }
 0x105   :  { %337 = vst [vmem:[#allocation8 + $0x20] sm:$0xff] %v194_v58  ;;  %v420_v59 = vpop.f32.mrf.mxu1 }
 0x106   :  { %v198_v60 = vpop.f32.mrf.mxu0  ;;  %344 = vst [vmem:[#allocation8 + $0x58] sm:$0xff] %v420_v59 }
 0x107   :  { %339 = vst [vmem:[#allocation8 + $0x30] sm:$0xff] %v198_v60  ;;  %v285_v61 = vpop.f32.mrf.mxu1 }
 0x108   :  { %v200_v62 = vpop.f32.mrf.mxu0  ;;  %341 = vst [vmem:[#allocation8 + $0x40] sm:$0xff] %v285_v61 }
 0x109   :  { %340 = vst [vmem:[#allocation8 + $0x38] sm:$0xff] %v200_v62 }
 0x10a   :  { %v204_v63 = vpop.f32.mrf.mxu0 }
 0x10b   :  { %342 = vst [vmem:[#allocation8 + $0x48] sm:$0xff] %v204_v63 }
 0x10c   :  { %v206_v0 = vpop.f32.mrf.mxu0 }
 0x10d   :  { %343 = vst [vmem:[#allocation8 + $0x50] sm:$0xff] %v206_v0 }
 0x10e   :  { %480 = shalt.err (!%p477_p0)
}
 0x10f   :  { %356 = dma.vmem_to_hbm [thread:$0]  %s351_s1, 1536, %s539_s2, [#allocation5], %s499_s19, %s499_s19, %s500_s20  }
 0x110   :  { %493 = dma.done.wait [#allocation5], 1536  }
 0x111   :  { %494 = vsyncadd [#allocation5], 4294965760 }
 0x112   :  { %360 = vsyncpa [#allocation4], 1 }
 0x113   :  { %361 = vsyncpa [#allocation7], 1 }
 0x114   :  { %362 = vsyncpa [#allocation5], 1 }

</bundles_post_ra>
